<compile_context>
chip_gen: v7x
topology: tpu7x:2x2x1
jax: 0.10.0
libtpu: 0.0.40
codegen_flags: <defaults>
</compile_context>

<pallas_src>
import functools
import math

import jax
import jax.numpy as jnp
from jax import lax
from jax.experimental import pallas as pl
from jax.experimental.pallas import tpu as pltpu


def _round_up(x: int, m: int) -> int:
    return -(-x // m) * m


def _rotary_kernel(offset_ref, table_ref, out_ref, *, k):
    # offset_ref: SMEM (1,) int32  -- scalar-prefetch offset
    # table_ref : VMEM (2, width) f32; row 0 = tile(concat(inv_freq, inv_freq), k)
    #             row 1 = (col // dim) * row 0   (per-column fold term)
    # out_ref   : VMEM (rows_per_block, width) f32
    #   element (r, c) = (offset + (block_base + r)*k + c // dim) * inv_freq_full[c % dim]
    rows = out_ref.shape[0]
    base = offset_ref[0] + pl.program_id(0) * (rows * k)           # scalar int32
    r = lax.broadcasted_iota(jnp.int32, out_ref.shape, 0)
    pos = (base + r * k).astype(jnp.float32)                       # row part of the position
    out_ref[...] = pos * table_ref[0:1, :] + table_ref[1:2, :]


def rotary_embedding(dim: int, max_seq_len: int, offset=0) -> jnp.ndarray:
    """Returns emb of shape (max_seq_len, 1, 1, dim), float32 — matches
    PyTorch RotaryEmbedding.forward(max_seq_len, offset)."""
    assert dim % 2 == 0, "rotary dim must be even"

    # "Parameter" setup (module __init__): inv_freq of shape (dim//2,)
    inv_freq = 1.0 / (1000000.0 ** (jnp.arange(0, dim, 2, dtype=jnp.float32) / dim))
    inv_freq_full = jnp.concatenate([inv_freq, inv_freq], axis=-1)  # (dim,)

    # ---- lane-dense folding factor k: fold k table rows into one output row ----
    k = 128 // math.gcd(dim, 128)          # smallest k with k*dim % 128 == 0
    while 2 * k * dim <= 512:              # widen toward 512 lanes (wider unmasked stores)
        k *= 2
    width = k * dim

    pad_seq = _round_up(max_seq_len, k)    # pad instead of falling back to masked stores
    n_folded = pad_seq // k

    # Tiny resident input: [inv_freq tiled; per-column fold term] -> no in-kernel int divide.
    invf_tiled = jnp.tile(inv_freq_full, k)                                   # (width,)
    col_fold = (jnp.arange(width, dtype=jnp.int32) // dim).astype(jnp.float32)
    table = jnp.stack([invf_tiled, col_fold * invf_tiled], axis=0)            # (2, width)

    # ---- rows per output block: ~8 MiB target (16 MiB double-buffered) ----
    bytes_per_row = width * 4
    target = max(8, ((8 << 20) // bytes_per_row) // 8 * 8)
    if n_folded * bytes_per_row > (2 << 20):
        # ensure >= 2 grid steps so both v7x TensorCores stream output DMAs
        half = _round_up(-(-n_folded // 2), 8)
        target = min(target, half)
    if target >= n_folded:
        rows_per_block = n_folded          # full array dim -> always legal
    else:
        rows_per_block = target            # multiple of 8; Pallas masks any tail block
    grid = (pl.cdiv(n_folded, rows_per_block),)

    kernel = functools.partial(_rotary_kernel, k=k)
    offset_arr = jnp.asarray(offset, dtype=jnp.int32).reshape(1)

    emb2d = pl.pallas_call(
        kernel,
        out_shape=jax.ShapeDtypeStruct((n_folded, width), jnp.float32),
        grid_spec=pltpu.PrefetchScalarGridSpec(
            num_scalar_prefetch=1,
            grid=grid,
            in_specs=[pl.BlockSpec((2, width), lambda i, off: (0, 0))],
            out_specs=pl.BlockSpec((rows_per_block, width), lambda i, off: (i, 0)),
        ),
        compiler_params=pltpu.CompilerParams(
            dimension_semantics=("parallel",),
            vmem_limit_bytes=32 << 20,     # explicit: exceeds v5e's 16 MiB default, safe on v6e/v7x
        ),
    )(offset_arr, table)

    # (n_folded, k*dim) is the row-major reinterpretation of (pad_seq, dim);
    # 'n d -> n 1 1 d' is a free reshape.  Slice only if we padded.
    emb_flat = emb2d.reshape(pad_seq, dim)
    if pad_seq != max_seq_len:
        emb_flat = emb_flat[:max_seq_len]
    return emb_flat.reshape(max_seq_len, 1, 1, dim)


def _reference(dim: int, max_seq_len: int, offset=0) -> jnp.ndarray:
    inv_freq = 1.0 / (1000000.0 ** (jnp.arange(0, dim, 2, dtype=jnp.float32) / dim))
    seq = jnp.arange(max_seq_len, dtype=jnp.float32) + jnp.float32(offset)
    freqs = jnp.einsum("i,j->ij", seq, inv_freq)
    emb = jnp.concatenate([freqs, freqs], axis=-1)
    return emb.reshape(max_seq_len, 1, 1, dim)


if __name__ == "__main__":
    key = jax.random.PRNGKey(0)  # no random tensors needed; kept for convention
    del key

    cases = [
        (32, 8, 0),      # module-implied small shape
        (64, 256, 3),    # folded lane-dense layout, nonzero offset
        (96, 101, 1),    # non-128-multiple dim + seq padding + wrapper slice
        (128, 8192, 7),  # multi-step grid (2 blocks -> megacore split)
    ]
    for dim, seqlen, off in cases:
        emb = jax.block_until_ready(rotary_embedding(dim, seqlen, off))
        ref = _reference(dim, seqlen, off)
        assert emb.shape == (seqlen, 1, 1, dim), (dim, seqlen, off)
        assert emb.dtype == jnp.float32
        assert jnp.allclose(emb, ref, atol=1e-5, rtol=1e-5), (dim, seqlen, off)

    print("KERNEL_OK")
</pallas_src>

<mosaic_0001>
module attributes {stable_mosaic.version = 11 : i64} {
  func.func @_rotary_kernel(%arg0: i32, %arg1: memref<1xi32, #tpu.memory_space<smem>>, %arg2: memref<2x512xf32, #tpu.memory_space<vmem>>, %arg3: memref<1x512xf32, #tpu.memory_space<vmem>>) attributes {dimension_semantics = [#tpu.dimension_semantics<parallel>], iteration_bounds = array<i64: 1>, scalar_prefetch = 1 : i64, scratch_operands = 0 : i64, tpu.core_type = #tpu.core_type<tc>, window_params = [{pipeline_mode = #tpu.pipeline_mode<synchronous>, transform_indices = @transform_0, window_bounds = array<i64: 2, 512>}, {transform_indices = @transform_1, window_bounds = array<i64: 1, 512>}]} {
    %c0 = arith.constant 0 : index
    %0 = memref.load %arg1[%c0] : memref<1xi32, #tpu.memory_space<smem>>
    %c16_i32 = arith.constant 16 : i32
    %1 = arith.muli %arg0, %c16_i32 : i32
    %2 = arith.addi %0, %1 : i32
    %3 = tpu.iota {dimensions = array<i32: 0>} : vector<1x512xi32>
    %c16_i32_0 = arith.constant 16 : i32
    %4 = vector.broadcast %c16_i32_0 : i32 to vector<1x512xi32>
    %5 = arith.muli %3, %4 : vector<1x512xi32>
    %6 = vector.broadcast %2 : i32 to vector<1x512xi32>
    %7 = arith.addi %6, %5 : vector<1x512xi32>
    %8 = arith.sitofp %7 : vector<1x512xi32> to vector<1x512xf32>
    %c0_1 = arith.constant 0 : index
    %c0_2 = arith.constant 0 : index
    %9 = vector.load %arg2[%c0_1, %c0_2] : memref<2x512xf32, #tpu.memory_space<vmem>>, vector<1x512xf32>
    %10 = arith.mulf %8, %9 : vector<1x512xf32>
    %c1 = arith.constant 1 : index
    %c0_3 = arith.constant 0 : index
    %11 = vector.load %arg2[%c1, %c0_3] : memref<2x512xf32, #tpu.memory_space<vmem>>, vector<1x512xf32>
    %12 = arith.addf %10, %11 : vector<1x512xf32>
    %c0_4 = arith.constant 0 : index
    %c0_5 = arith.constant 0 : index
    %13 = vector.load %arg3[%c0_4, %c0_5] : memref<1x512xf32, #tpu.memory_space<vmem>>, vector<1x512xf32>
    tpu.vector_store %arg3[%c0_4, %c0_5], %12 {strides = array<i32>} : memref<1x512xf32, #tpu.memory_space<vmem>>, vector<1x512xf32>,
    return
  }
  func.func @transform_0(%arg0: i32, %arg1: memref<1xi32, #tpu.memory_space<smem>>) -> (i32, i32) {
    %c0_i32 = arith.constant 0 : i32
    %c0_i32_0 = arith.constant 0 : i32
    %c0_i32_1 = arith.constant 0 : i32
    return %c0_i32, %c0_i32_0 : i32, i32
  }
  func.func @transform_1(%arg0: i32, %arg1: memref<1xi32, #tpu.memory_space<smem>>) -> (i32, i32) {
    %c0_i32 = arith.constant 0 : i32
    %c0_i32_0 = arith.constant 0 : i32
    return %arg0, %c0_i32 : i32, i32
  }
}

</mosaic_0001>

<bundles_post_ra>
// kernel: tpu_custom_call.1
= control target key start
LH: loop header
LB: loop body
LE: loop exit
PB: predicated region body
PF: predicated region fallthrough
CT: control target
= control target key end

     0   :  { %8 = vsyncpa [#allocation5], 0  ;;  %s230_s0 = inlined_call_operand.<no memory space> [shape: s32[1], index: 0, kind: input, shape index: {}]   ;;  %s231_s1 = inlined_call_operand.hbm [shape: f32[2,512], index: 1, kind: input, shape index: {}]   ;;  %s232_s2 = inlined_call_operand.hbm [shape: f32[1,512], index: 2, kind: output, shape index: {}]  }
   0x1   :  { %9 = vsyncpa [#allocation6], 0  ;;  %s185_s9 = smov [#allocation4]   ;;  %s137_s13 = scalar_lea.hbm %s231_s1, 128 }
   0x2   :  { %s16_s10 = sshll.u32 %s185_s9, 4  ;;  %p138_p0 = scmp.ne.s32.totalorder %s231_s1, %s137_s13  ;;  %s17_s10 = int_to_ptr.vmem [resolvable:$true] %s16_s10 }
   0x3   :  { %p141_p1 = scmp.lt.u32.totalorder %s137_s13, %s231_s1 }
   0x5   :  { %p143_p2 = pnand %p141_p1, %p138_p0 }
   0x7   :  { %146 = shalt.err (!%p143_p2)
}
   0x8   :  { %s147_s18 = scalar_lea.vmem %s17_s10, 128  ;;  %p152_p4 = scmp.lt.s32.totalorder %s17_s10, %s17_s10 }
   0x9   :  { %p148_p3 = scmp.ne.s32.totalorder %s17_s10, %s147_s18  ;;  %p153_p5 = scmp.lt.s32.totalorder %s147_s18, %s147_s18 }
   0xb   :  { %p154_p6 = por %p153_p5, %p152_p4 }
   0xd   :  { %p155_p7 = pnand %p154_p6, %p148_p3 }
   0xf   :  { %158 = shalt.err (!%p155_p7)
}
  0x10   :  { %19 = dma.hbm_to_vmem [thread:$0]  %s231_s1, 128, %s17_s10, [#allocation5]  }
  0x11   :  { %181 = dma.done.wait [#allocation5], 128  }
  0x12   :  { %182 = vsyncadd [#allocation5], 4294967168  ;;  %v26_v0 = vlaneseq  ;;  %v29_v2 = vstv %s230_s0  ;;  %v186_v3 = vmov 1966171168   ;;  %s187_s0 = smov [#allocation7]  }
  0x13   :  { %v92_v4 = vunpack.c.l.s4 %v186_v3  ;;  %v32_v11 = vld [vmem:[#allocation4] ss:$2 sm:$0xf]  ;;  %v59_v12 = vld [vmem:[#allocation4 + $0x1] ss:$2 sm:$0xf] }
  0x14   :  { %v27_v1 = vshrl.u32 %v26_v0, 7  ;;  %s125_s1 = sshll.u32 %s187_s0, 4  ;;  %vm116_vm0 = vcmp.lt.s32.totalorder %v26_v0, 512  ;;  %s126_s1 = int_to_ptr.vmem [resolvable:$true] %s125_s1 }
  0x15   :  { %v93_v13 = vunpack.c.0.s8 %v92_v4  ;;  %s159_s23 = scalar_lea.vmem %s126_s1, 64  ;;  %p164_p9 = scmp.lt.s32.totalorder %s126_s1, %s126_s1 }
  0x16   :  { %v28_v5 = vmul.u32 16, %v27_v1  ;;  %v36_v6 = vsub.s32 0, %v27_v1  ;;  %v40_v7 = vsub.s32 1, %v27_v1  ;;  %v44_v8 = vsub.s32 2, %v27_v1  ;;  %p160_p8 = scmp.ne.s32.totalorder %s126_s1, %s159_s23  ;;  %p165_p10 = scmp.lt.s32.totalorder %s159_s23, %s159_s23 }
  0x17   :  { %v48_v9 = vsub.s32 3, %v27_v1  ;;  %v96_v30 = vsub.s32 %v93_v13, %v27_v1 }
  0x18   :  { %v30_v10 = vadd.s32 %v29_v2, %v28_v5  ;;  %v37_v15 = vrot.slane %v32_v11, %v36_v6  ;;  %v41_v16 = vrot.slane %v32_v11, %v40_v7  ;;  %v45_v17 = vrot.slane %v32_v11, %v44_v8  ;;  %p166_p11 = por %p165_p10, %p164_p9 }
  0x19   :  { %v49_v18 = vrot.slane %v32_v11, %v48_v9  ;;  %v64_v19 = vrot.slane %v59_v12, %v36_v6  ;;  %v68_v20 = vrot.slane %v59_v12, %v40_v7  ;;  %v72_v21 = vrot.slane %v59_v12, %v44_v8 }
  0x1a   :  { %v31_v14 = vcvt.s32.f32 %v30_v10  ;;  %v76_v25 = vrot.slane %v59_v12, %v48_v9  ;;  %p167_p12 = pnand %p166_p11, %p160_p8 }
  0x1c   :  { %v54_v22 = vmul.f32 %v37_v15, %v31_v14  ;;  %v55_v23 = vmul.f32 %v41_v16, %v31_v14  ;;  %v56_v24 = vmul.f32 %v45_v17, %v31_v14  ;;  %v57_v26 = vmul.f32 %v49_v18, %v31_v14 }
  0x1e   :  { %v81_v27 = vadd.f32 %v64_v19, %v54_v22  ;;  %v82_v28 = vadd.f32 %v68_v20, %v55_v23  ;;  %v83_v29 = vadd.f32 %v72_v21, %v56_v24  ;;  %v84_v31 = vadd.f32 %v76_v25, %v57_v26 }
  0x20   :  { %v89_v32 = vcombine.low %v81_v27, %v82_v28  ;;  %v90_v33 = vcombine.low %v83_v29, %v84_v31 }
  0x22   :  { %v97_v34 = vrot.slane %v89_v32, %v96_v30  ;;  %v104_v35 = vrot.slane %v90_v33, %v96_v30 }
  0x24   :  { %v105_v36 = vcombine.low %v97_v34, %v104_v35 }
  0x26   :  { %v112_v37 = vrot.slane %v105_v36, %v96_v30 }
  0x28   :  { %118 = vst.msk [vmem:[#allocation7] sm:$0xf] %vm116_vm0, %v112_v37 }
  0x29   :  { %170 = shalt.err (!%p167_p12)
}
  0x2a   :  { %s171_s26 = scalar_lea.hbm %s232_s2, 64 }
  0x2b   :  { %p172_p13 = scmp.ne.s32.totalorder %s232_s2, %s171_s26  ;;  %p175_p0 = scmp.lt.u32.totalorder %s171_s26, %s232_s2 }
  0x2d   :  { %p177_p1 = pnand %p175_p0, %p172_p13 }
  0x2f   :  { %180 = shalt.err (!%p177_p1)
}
  0x30   :  { %128 = dma.vmem_to_hbm [thread:$0]  %s126_s1, 64, %s232_s2, [#allocation6]  }
  0x31   :  { %183 = dma.done.wait [#allocation6], 64  }
  0x32   :  { %184 = vsyncadd [#allocation6], 4294967232 }
  0x33   :  { %132 = vsyncpa [#allocation5], 1 }
  0x34   :  { %133 = vsyncpa [#allocation6], 1 }

</bundles_post_ra>
